<compile_context>
chip_gen: v5e
topology: v5e:2x2
jax: 0.10.0
libtpu: 0.0.40
codegen_flags: <defaults>
</compile_context>

<pallas_src>
import jax
import jax.numpy as jnp
import numpy as np
from jax.experimental import pallas as pl
from jax.experimental.pallas import tpu as pltpu

EPS = 1e-7
LANES = 128


def _round_up(a, m):
    return -(-a // m) * m


def _sublane_rows(itemsize):
    # rows packed into one (8, 128) f32-equivalent VMEM tile for this dtype
    return 8 * max(1, 4 // max(int(itemsize), 1))


def _tile_bytes(rows, hw_t, itemsize):
    return _round_up(rows, _sublane_rows(itemsize)) * hw_t * int(itemsize)


def _vmem_capacity_bytes():
    try:
        info = pltpu.get_tpu_info()
        cap = getattr(info, "vmem_capacity_bytes", None)
        if cap:
            return int(cap)
    except Exception:
        pass
    return 64 << 20  # conservative: v7x per-core VMEM


def _dice_stats_kernel(x_ref, t_ref, out_ref, acc_ref):
    """Accumulate per-lane partial intersection / cardinality sums.

    x_ref, t_ref : (R, hw_t) native-dtype tiles (R = B*C)
    out_ref      : (1, R, 2*LANES) f32 per-core partial stats
    acc_ref      : (R, 2*LANES) f32 scratch; lanes [0:128) = intersection,
                   lanes [128:256) = cardinality partials.
    """
    h = pl.program_id(1)
    hw_t = x_ref.shape[1]

    @pl.when(h == 0)
    def _init():
        acc_ref[...] = jnp.zeros_like(acc_ref)

    inter = acc_ref[:, :LANES]
    card = acc_ref[:, LANES:]
    # Upcast per 128-lane block right after the VMEM load; pure VPU work on
    # vreg-aligned lane slices (no cross-lane reduces per step).
    for k in range(hw_t // LANES):
        xk = x_ref[:, k * LANES:(k + 1) * LANES].astype(jnp.float32)
        tk = t_ref[:, k * LANES:(k + 1) * LANES].astype(jnp.float32)
        inter = inter + xk * tk
        card = card + (xk + tk)
    acc_ref[:, :LANES] = inter
    acc_ref[:, LANES:] = card

    @pl.when(h == pl.num_programs(1) - 1)
    def _finalize():
        out_ref[...] = acc_ref[...].reshape(out_ref.shape)


def dice_loss_dann(x, label_true, domains):
    """x, label_true: (B, C, H, W) (any float dtype); domains: (B, n_domains)."""
    B, C, H, W = x.shape
    R = B * C
    HW = H * W
    x_isz = x.dtype.itemsize
    t_isz = label_true.dtype.itemsize

    # ---- hardware-aware tile sizing -------------------------------------
    vmem_cap = _vmem_capacity_bytes()
    budget = min(20 << 20, vmem_cap // 4)       # double-buffered x+t slab budget
    per_col = 2 * (_round_up(R, _sublane_rows(x_isz)) * x_isz +
                   _round_up(R, _sublane_rows(t_isz)) * t_isz)
    cap = (budget // max(per_col, 1)) // LANES * LANES
    cap = int(min(max(cap, 1024), 4096))        # >=1024-lane DMA rows, <=4096 (diminishing returns)

    HW128 = _round_up(HW, LANES)
    hw_t = min(cap, HW128)
    # Split across the two v7x TensorCores only if each core gets >= 512 lanes.
    ncores = 2 if HW128 >= 1024 else 1
    if ncores == 2:
        hw_t = min(hw_t, max(LANES, (HW128 // 2) // LANES * LANES))
    n_tiles = _round_up(-(-HW // hw_t), ncores)
    tiles_per_core = n_tiles // ncores
    HW_pad = n_tiles * hw_t

    # Metadata-only reshape; NO dtype cast (keeps HBM traffic minimal).
    xr = x.reshape(R, HW)
    tr = label_true.reshape(R, HW)
    if HW_pad != HW:
        # Zero padding contributes 0 to both intersection and cardinality.
        xr = jnp.pad(xr, ((0, 0), (0, HW_pad - HW)))
        tr = jnp.pad(tr, ((0, 0), (0, HW_pad - HW)))

    ws = 2 * (_tile_bytes(R, hw_t, x_isz) + _tile_bytes(R, hw_t, t_isz))
    ws += 3 * _round_up(R, 8) * 2 * LANES * 4   # scratch + output-block buffers
    vmem_limit = int(max(16 << 20, min(vmem_cap - (8 << 20), 4 * ws)))

    grid_spec = pltpu.PrefetchScalarGridSpec(
        num_scalar_prefetch=0,
        grid=(ncores, tiles_per_core),
        in_specs=[
            pl.BlockSpec((R, hw_t), lambda c, h: (0, c * tiles_per_core + h)),
            pl.BlockSpec((R, hw_t), lambda c, h: (0, c * tiles_per_core + h)),
        ],
        out_specs=pl.BlockSpec((1, R, 2 * LANES), lambda c, h: (c, 0, 0)),
        scratch_shapes=[pltpu.VMEM((R, 2 * LANES), jnp.float32)],
    )

    stats = pl.pallas_call(
        _dice_stats_kernel,
        out_shape=jax.ShapeDtypeStruct((ncores, R, 2 * LANES), jnp.float32),
        grid_spec=grid_spec,
        compiler_params=pltpu.CompilerParams(
            dimension_semantics=("parallel", "arbitrary"),
            vmem_limit_bytes=vmem_limit),
    )(xr, tr)

    # ---- tiny finalize in the wrapper (combine cores + lanes + domains) --
    inter = jnp.sum(stats[..., :LANES], axis=(0, 2)).reshape(B, C)
    card = jnp.sum(stats[..., LANES:], axis=(0, 2)).reshape(B, C)
    dom = jnp.argmax(domains, axis=1)

    def _domain_loss(d):
        w = (dom == d).astype(jnp.float32)[:, None]          # (B, 1)
        i = jnp.sum(inter * w, axis=0)                        # (C,)
        c = jnp.sum(card * w, axis=0)                         # (C,)
        dice = 2.0 * i / (c + EPS)
        return 1.0 - jnp.mean(dice)

    loss0 = _domain_loss(0)
    loss1 = _domain_loss(1)
    return loss0 + loss1, [loss0, loss1]


def _reference(x, label_true, domains):
    """Pure-numpy reference reproducing the PyTorch forward exactly."""
    xf = np.asarray(jnp.asarray(x, jnp.float32), np.float64)
    tf = np.asarray(jnp.asarray(label_true, jnp.float32), np.float64)
    d = np.asarray(jnp.asarray(domains, jnp.float32))
    dom = np.argmax(d, axis=1)

    def dice(xm, tm):
        inter = np.sum(xm * tm, axis=(0, 2, 3))
        card = np.sum(xm + tm, axis=(0, 2, 3))
        return 1.0 - np.mean(2.0 * inter / (card + EPS))

    l0 = dice(xf[dom == 0], tf[dom == 0])
    l1 = dice(xf[dom == 1], tf[dom == 1])
    return l0 + l1, [l0, l1]


if __name__ == "__main__":
    key = jax.random.PRNGKey(0)
    k1, k2, k3 = jax.random.split(key, 3)

    # Case 1: lane-aligned spatial extent, bf16 inputs, exercises the 2-way
    # "parallel" core split (HW = 1024 -> two 512-lane tiles).
    B, C, H, W = 8, 4, 32, 32
    N_DOMAINS = 2
    x = jax.nn.softmax(
        jax.random.normal(k1, (B, C, H, W), jnp.float32), axis=1
    ).astype(jnp.bfloat16)
    label_true = (jax.random.uniform(k2, (B, C, H, W)) > 0.5).astype(jnp.bfloat16)
    domains = jax.random.normal(k3, (B, N_DOMAINS), jnp.float32)

    loss, (loss0, loss1) = dice_loss_dann(x, label_true, domains)
    jax.block_until_ready(loss)

    ref_loss, (ref0, ref1) = _reference(x, label_true, domains)
    assert np.allclose(float(loss0), ref0, rtol=1e-4, atol=1e-5), (float(loss0), ref0)
    assert np.allclose(float(loss1), ref1, rtol=1e-4, atol=1e-5), (float(loss1), ref1)
    assert np.allclose(float(loss), ref_loss, rtol=1e-4, atol=1e-5), (float(loss), ref_loss)

    # Case 2: unaligned spatial extent (HW = 252), f32 inputs, exercises the
    # zero-padding path and the single-core grid.
    k4, k5, k6 = jax.random.split(jax.random.PRNGKey(1), 3)
    B2, C2, H2, W2 = 4, 4, 18, 14
    x2 = jax.nn.softmax(
        jax.random.normal(k4, (B2, C2, H2, W2), jnp.float32), axis=1
    ).astype(jnp.float32)
    t2 = (jax.random.uniform(k5, (B2, C2, H2, W2)) > 0.5).astype(jnp.float32)
    d2 = jax.random.normal(k6, (B2, N_DOMAINS), jnp.float32)

    loss_b, (l0b, l1b) = dice_loss_dann(x2, t2, d2)
    jax.block_until_ready(loss_b)
    ref_b, (r0b, r1b) = _reference(x2, t2, d2)
    assert np.allclose(float(l0b), r0b, rtol=1e-4, atol=1e-5), (float(l0b), r0b)
    assert np.allclose(float(l1b), r1b, rtol=1e-4, atol=1e-5), (float(l1b), r1b)
    assert np.allclose(float(loss_b), ref_b, rtol=1e-4, atol=1e-5), (float(loss_b), ref_b)

    print("KERNEL_OK")
</pallas_src>

<mosaic_0001>
module attributes {stable_mosaic.version = 11 : i64} {
  func.func @_dice_stats_kernel(%arg0: i32, %arg1: i32, %arg2: memref<32x512xbf16, #tpu.memory_space<vmem>>, %arg3: memref<32x512xbf16, #tpu.memory_space<vmem>>, %arg4: memref<1x32x256xf32, #tpu.memory_space<vmem>>, %arg5: memref<32x256xf32, #tpu.memory_space<vmem>>) attributes {dimension_semantics = [#tpu.dimension_semantics<parallel>, #tpu.dimension_semantics<arbitrary>], iteration_bounds = array<i64: 2, 1>, scalar_prefetch = 0 : i64, scratch_operands = 1 : i64, tpu.core_type = #tpu.core_type<tc>, window_params = [{transform_indices = @transform_0, window_bounds = array<i64: 32, 512>}, {transform_indices = @transform_1, window_bounds = array<i64: 32, 512>}, {transform_indices = @transform_2, window_bounds = array<i64: 1, 32, 256>}]} {
    %c0_i32 = arith.constant 0 : i32
    %0 = arith.cmpi eq, %arg1, %c0_i32 : i32
    %1 = arith.extui %0 : i1 to i32
    %c0_i32_0 = arith.constant 0 : i32
    %2 = arith.cmpi ne, %1, %c0_i32_0 : i32
    scf.if %2 {
      %cst = arith.constant 0.000000e+00 : f32
      %42 = vector.broadcast %cst : f32 to vector<32x256xf32>
      %c0_23 = arith.constant 0 : index
      %c0_24 = arith.constant 0 : index
      %43 = vector.load %arg5[%c0_23, %c0_24] : memref<32x256xf32, #tpu.memory_space<vmem>>, vector<32x256xf32>
      tpu.vector_store %arg5[%c0_23, %c0_24], %42 {strides = array<i32>} : memref<32x256xf32, #tpu.memory_space<vmem>>, vector<32x256xf32>,
    } else {
    }
    %c0 = arith.constant 0 : index
    %c0_1 = arith.constant 0 : index
    %3 = vector.load %arg5[%c0, %c0_1] : memref<32x256xf32, #tpu.memory_space<vmem>>, vector<32x128xf32>
    %c0_2 = arith.constant 0 : index
    %c128 = arith.constant 128 : index
    %4 = vector.load %arg5[%c0_2, %c128] : memref<32x256xf32, #tpu.memory_space<vmem>>, vector<32x128xf32>
    %c0_3 = arith.constant 0 : index
    %c0_4 = arith.constant 0 : index
    %5 = vector.load %arg2[%c0_3, %c0_4] : memref<32x512xbf16, #tpu.memory_space<vmem>>, vector<32x128xbf16>
    %6 = arith.extf %5 : vector<32x128xbf16> to vector<32x128xf32>
    %c0_5 = arith.constant 0 : index
    %c0_6 = arith.constant 0 : index
    %7 = vector.load %arg3[%c0_5, %c0_6] : memref<32x512xbf16, #tpu.memory_space<vmem>>, vector<32x128xbf16>
    %8 = arith.extf %7 : vector<32x128xbf16> to vector<32x128xf32>
    %9 = arith.mulf %6, %8 : vector<32x128xf32>
    %10 = arith.addf %3, %9 : vector<32x128xf32>
    %11 = arith.addf %6, %8 : vector<32x128xf32>
    %12 = arith.addf %4, %11 : vector<32x128xf32>
    %c0_7 = arith.constant 0 : index
    %c128_8 = arith.constant 128 : index
    %13 = vector.load %arg2[%c0_7, %c128_8] : memref<32x512xbf16, #tpu.memory_space<vmem>>, vector<32x128xbf16>
    %14 = arith.extf %13 : vector<32x128xbf16> to vector<32x128xf32>
    %c0_9 = arith.constant 0 : index
    %c128_10 = arith.constant 128 : index
    %15 = vector.load %arg3[%c0_9, %c128_10] : memref<32x512xbf16, #tpu.memory_space<vmem>>, vector<32x128xbf16>
    %16 = arith.extf %15 : vector<32x128xbf16> to vector<32x128xf32>
    %17 = arith.mulf %14, %16 : vector<32x128xf32>
    %18 = arith.addf %10, %17 : vector<32x128xf32>
    %19 = arith.addf %14, %16 : vector<32x128xf32>
    %20 = arith.addf %12, %19 : vector<32x128xf32>
    %c0_11 = arith.constant 0 : index
    %c256 = arith.constant 256 : index
    %21 = vector.load %arg2[%c0_11, %c256] : memref<32x512xbf16, #tpu.memory_space<vmem>>, vector<32x128xbf16>
    %22 = arith.extf %21 : vector<32x128xbf16> to vector<32x128xf32>
    %c0_12 = arith.constant 0 : index
    %c256_13 = arith.constant 256 : index
    %23 = vector.load %arg3[%c0_12, %c256_13] : memref<32x512xbf16, #tpu.memory_space<vmem>>, vector<32x128xbf16>
    %24 = arith.extf %23 : vector<32x128xbf16> to vector<32x128xf32>
    %25 = arith.mulf %22, %24 : vector<32x128xf32>
    %26 = arith.addf %18, %25 : vector<32x128xf32>
    %27 = arith.addf %22, %24 : vector<32x128xf32>
    %28 = arith.addf %20, %27 : vector<32x128xf32>
    %c0_14 = arith.constant 0 : index
    %c384 = arith.constant 384 : index
    %29 = vector.load %arg2[%c0_14, %c384] : memref<32x512xbf16, #tpu.memory_space<vmem>>, vector<32x128xbf16>
    %30 = arith.extf %29 : vector<32x128xbf16> to vector<32x128xf32>
    %c0_15 = arith.constant 0 : index
    %c384_16 = arith.constant 384 : index
    %31 = vector.load %arg3[%c0_15, %c384_16] : memref<32x512xbf16, #tpu.memory_space<vmem>>, vector<32x128xbf16>
    %32 = arith.extf %31 : vector<32x128xbf16> to vector<32x128xf32>
    %33 = arith.mulf %30, %32 : vector<32x128xf32>
    %34 = arith.addf %26, %33 : vector<32x128xf32>
    %35 = arith.addf %30, %32 : vector<32x128xf32>
    %36 = arith.addf %28, %35 : vector<32x128xf32>
    %c0_17 = arith.constant 0 : index
    %c0_18 = arith.constant 0 : index
    %37 = vector.load %arg5[%c0_17, %c0_18] : memref<32x256xf32, #tpu.memory_space<vmem>>, vector<32x128xf32>
    tpu.vector_store %arg5[%c0_17, %c0_18], %34 {strides = array<i32>} : memref<32x256xf32, #tpu.memory_space<vmem>>, vector<32x128xf32>,
    %c0_19 = arith.constant 0 : index
    %c128_20 = arith.constant 128 : index
    %38 = vector.load %arg5[%c0_19, %c128_20] : memref<32x256xf32, #tpu.memory_space<vmem>>, vector<32x128xf32>
    tpu.vector_store %arg5[%c0_19, %c128_20], %36 {strides = array<i32>} : memref<32x256xf32, #tpu.memory_space<vmem>>, vector<32x128xf32>,
    %c0_i32_21 = arith.constant 0 : i32
    %39 = arith.cmpi eq, %arg1, %c0_i32_21 : i32
    %40 = arith.extui %39 : i1 to i32
    %c0_i32_22 = arith.constant 0 : i32
    %41 = arith.cmpi ne, %40, %c0_i32_22 : i32
    scf.if %41 {
      %c0_23 = arith.constant 0 : index
      %c0_24 = arith.constant 0 : index
      %42 = vector.load %arg5[%c0_23, %c0_24] : memref<32x256xf32, #tpu.memory_space<vmem>>, vector<32x256xf32>
      %43 = vector.shape_cast %42 : vector<32x256xf32> to vector<1x32x256xf32>
      %c0_25 = arith.constant 0 : index
      %c0_26 = arith.constant 0 : index
      %c0_27 = arith.constant 0 : index
      %44 = vector.load %arg4[%c0_25, %c0_26, %c0_27] : memref<1x32x256xf32, #tpu.memory_space<vmem>>, vector<1x32x256xf32>
      tpu.vector_store %arg4[%c0_25, %c0_26, %c0_27], %43 {strides = array<i32>} : memref<1x32x256xf32, #tpu.memory_space<vmem>>, vector<1x32x256xf32>,
    } else {
    }
    return
  }
  func.func @transform_0(%arg0: i32, %arg1: i32) -> (i32, i32) {
    %c1_i32 = arith.constant 1 : i32
    %0 = arith.muli %arg0, %c1_i32 : i32
    %1 = arith.addi %0, %arg1 : i32
    %c0_i32 = arith.constant 0 : i32
    %c0_i32_0 = arith.constant 0 : i32
    return %c0_i32, %1 : i32, i32
  }
  func.func @transform_1(%arg0: i32, %arg1: i32) -> (i32, i32) {
    %c1_i32 = arith.constant 1 : i32
    %0 = arith.muli %arg0, %c1_i32 : i32
    %1 = arith.addi %0, %arg1 : i32
    %c0_i32 = arith.constant 0 : i32
    %c0_i32_0 = arith.constant 0 : i32
    return %c0_i32, %1 : i32, i32
  }
  func.func @transform_2(%arg0: i32, %arg1: i32) -> (i32, i32, i32) {
    %c0_i32 = arith.constant 0 : i32
    %c0_i32_0 = arith.constant 0 : i32
    %c0_i32_1 = arith.constant 0 : i32
    return %arg0, %c0_i32, %c0_i32_0 : i32, i32, i32
  }
}

</mosaic_0001>

<bundles_post_ra>
// kernel: tpu_custom_call.1
= control target key start
LH: loop header
LB: loop body
LE: loop exit
PB: predicated region body
PF: predicated region fallthrough
CT: control target
= control target key end

     0   :  { %s964_s0 = inlined_call_operand.hbm [shape: bf16[32,1024], index: 0, kind: input, shape index: {}]   ;;  %s965_s1 = inlined_call_operand.hbm [shape: bf16[32,1024], index: 1, kind: input, shape index: {}]   ;;  %s966_s2 = inlined_call_operand.hbm [shape: f32[2,32,256], index: 2, kind: output, shape index: {}]  }
   0x1   :  { %967 = sst [smem:[#allocation12_spill]] %s964_s0 }
   0x2   :  { %7 = vsyncpa [#allocation4], 0 }
   0x3   :  { %9 = vsyncpa [#allocation4 + $0x1], 0 }
   0x4   :  { %10 = vsyncpa [#allocation7], 0 }
   0x5   :  { %12 = vsyncpa [#allocation7 + $0x1], 0 }
   0x6   :  { %13 = vsyncpa [#allocation5], 0 }
   0x7   :  { %15 = vsyncpa [#allocation5 + $0x1], 0  ;;  %s787_s9 = smov 0   ;;  %s789_s10 = smov 0  }
   0x8   :  { %s791_s11 = smov 0   ;;  %s793_s12 = smov 0  }
   0x9   :  { %s795_s13 = smov 0   ;;  %s797_s14 = smov 0  }
   0xa LB: > { %s525_s15 = sadd.s32 4294967295, %s765_s14   ;;  %s526_s16 = sadd.s32 4294967294, %s765_s14   ;;  %s765_s14 = sphi %s797_s14, %s21_s14   ;;  %s761_s13 = sphi %s795_s13, %s978_s13   ;;  %s757_s12 = sphi %s793_s12, %s977_s12   ;;  %s753_s11 = sphi %s791_s11, %s976_s11   ;;  %s749_s10 = sphi %s789_s10, %s975_s10   ;;  %s745_s9 = sphi %s787_s9, %s974_s9  }
   0xb   : > { %s33_s17 = sadd.s32 1, %s761_s13  ;;  %s42_s18 = sadd.s32 1, %s753_s11 }
   0xc   : > { %p35_p0 = scmp.ge.s32.totalorder %s33_s17, 2  ;;  %p49_p1 = scmp.ne.s32.totalorder %s753_s11, %s749_s10 }
   0xd   : > { %p50_p2 = scmp.eq.s32.totalorder %s765_s14, 0  ;;  %p55_p3 = scmp.ne.s32.totalorder %s749_s10, %s745_s9 }
   0xe   : > { %s980_s17 = smov (%p35_p0, %s33_s17), 0  ;;  %p56_p5 = scmp.eq.s32.totalorder %s525_s15, 0 }
   0xf   : > { %p828_p4 = por %p50_p2, %p49_p1  ;;  %s39_s20 = ssub.s32 %s761_s13, %s980_s17 }
  0x10   : > { %p107_p6 = scmp.eq.s32.totalorder %s525_s15, 1  ;;  %p40_p7 = scmp.eq.s32.totalorder %s39_s20, 0 }
  0x11   : > { %p834_p8 = por %p56_p5, %p55_p3  ;;  %p113_p10 = scmp.eq.s32.totalorder %s526_s16, 1 }
  0x12   : > { %p838_p9 = por %p107_p6, %p49_p1  ;;  %p528_p12 = scmp.ge.s32.totalorder %s765_s14, 2 }
  0x13   : > { %s843_s23 = scalar_select %p40_p7, %s753_s11, %s42_s18  }
  0x14   : > { %p845_p11 = por %p113_p10, %p55_p3  ;;  %p564_p13 = scmp.lt.s32.totalorder %s765_s14, 2 }
  0x15   : > { %s852_s25 = sand.u32 1, %s753_s11   ;;  %s544_s27 = sshll.u32 %s761_s13, 4 }
  0x16   : > { %s529_s26 = sshll.u32 %s852_s25, 6  ;;  %s972_s0 = sld [smem:[#allocation12_spill]] }
  0x17   : > { %s137_s3 = scalar_lea.vmem [#allocation3], %s529_s26  ;;  %p861_p0 = pnand %p564_p13, %p828_p4 }
  0x18   : > { %s146_s4 = sshll.u32 %s137_s3, 4  ;;  %s134_s7 = scalar_lea.sflag [#allocation4], %s852_s25  ;;  %s147_s4 = int_to_ptr.vmem [resolvable:$true] %s146_s4 }
  0x19   : > { %s767_s8 = smov 512   ;;  %s768_s15 = smov 256  }
  0x1a   : > { %s769_s16 = smov 16   ;;  %p535_p1 = scmp.ge.s32.totalorder %s765_s14, 1 }
  0x1b   : > { %p177_p2 = scmp.lt.s32.totalorder %s765_s14, 3  ;;  %s166_s19 = scalar_lea.hbm %s965_s1, %s544_s27 }
  0x1c   : > { %s143_s30 = scalar_lea.hbm %s972_s0, %s544_s27  ;;  %s167_s28 = sshll.u32 %s166_s19, 4  ;;  %s168_s28 = int_to_ptr.hbm [resolvable:$true] %s167_s28 }
  0x1d   : > { %s144_s5 = sshll.u32 %s143_s30, 4  ;;  %p178_p3 = pnand %p535_p1, %p177_p2  ;;  %s145_s5 = int_to_ptr.hbm [resolvable:$true] %s144_s5 }
  0x1e   : > { %556 = dma.hbm_to_vmem [thread:$0]  (!%p861_p0), %s145_s5, 1024, %s147_s4, %s134_s7, %s767_s8, %s768_s15, %s769_s16  }
  0x1f   : > { %s160_s29 = scalar_lea.vmem [#allocation6], %s529_s26  ;;  %s157_s3 = scalar_lea.sflag [#allocation7], %s852_s25 }
  0x20   : > { %s169_s30 = sshll.u32 %s160_s29, 4  ;;  %181 = sbr.rel (%p178_p3) target bundleno = 72 (0x48), region = 28  ;;  %s170_s30 = int_to_ptr.vmem [resolvable:$true] %s169_s30 }
  0x21   : > { %559 = dma.hbm_to_vmem [thread:$0]  (!%p861_p0), %s168_s28, 1024, %s170_s30, %s157_s3, %s767_s8, %s768_s15, %s769_s16  }
  0x22   : > { %s877_s0 = sand.u32 (!%p178_p3), 1, %s749_s10  }
  0x23   : > { %s880_s4 = sshll.u32 (!%p178_p3), %s877_s0, 6  ;;  %s184_s5 = scalar_lea.sflag (!%p178_p3), [#allocation4], %s877_s0 }
  0x24   : > { %s884_s27 = scalar_lea.vmem (!%p178_p3), [#allocation3], %s880_s4 }
  0x25   : > { %732 = dma.done.wait (%p834_p8), %s184_s5, 1024  }
  0x26   : > { %734 = vsyncadd (%p834_p8), %s184_s5, 4294966272  ;;  %s194_s25 = scalar_lea.sflag [#allocation7], %s877_s0  ;;  %s892_s26 = scalar_lea.vmem [#allocation6], %s880_s4 }
  0x27   : > { %736 = dma.done.wait (%p834_p8), %s194_s25, 1024  }
  0x28   : > { %738 = vsyncadd (%p834_p8), %s194_s25, 4294966272  ;;  %v248_v0 = vld [vmem:[%s884_s27] sm:$0xff]   ;;  %v312_v2 = vld [vmem:[%s884_s27 + $0x8] sm:$0xff]   ;;  %s911_s21 = scalar_lea.vmem [#allocation8], %s880_s4  ;;  %s546_s6 = sshll.u32 %s757_s12, 6 }
  0x29   : > { %v256_v1 = vld [vmem:[%s892_s26] sm:$0xff]   ;;  %v252_v3 = vunpack.c.l.bf16 %v248_v0  ;;  %v284_v5 = vunpack.c.h.bf16 %v248_v0  ;;  %v320_v7 = vld [vmem:[%s892_s26 + $0x8] sm:$0xff]   ;;  %v316_v8 = vunpack.c.l.bf16 %v312_v2  ;;  %v348_v10 = vunpack.c.h.bf16 %v312_v2  ;;  %v249_v12 = vld [vmem:[%s884_s27 + $0x10] sm:$0xff]   ;;  %s415_s15 = scalar_lea.hbm %s966_s2, %s546_s6  ;;  %s416_s12 = sshll.u32 %s911_s21, 4  ;;  %s417_s12 = int_to_ptr.vmem [resolvable:$true] %s416_s12 }
  0x2a   : > { %v260_v4 = vunpack.c.l.bf16 %v256_v1  ;;  %v292_v6 = vunpack.c.h.bf16 %v256_v1  ;;  %v324_v9 = vunpack.c.l.bf16 %v320_v7  ;;  %v356_v11 = vunpack.c.h.bf16 %v320_v7  ;;  %v257_v13 = vld [vmem:[%s892_s26 + $0x10] sm:$0xff]   ;;  %v313_v18 = vld [vmem:[%s884_s27 + $0x18] sm:$0xff]   ;;  %v250_v36 = vld [vmem:[%s884_s27 + $0x20] sm:$0xff]   ;;  %s418_s16 = sshll.u32 %s415_s15, 4  ;;  %s404_s18 = scalar_lea.sflag [#allocation5], %s877_s0  ;;  %s419_s16 = int_to_ptr.hbm [resolvable:$true] %s418_s16 }
  0x2b   : > { %v321_v19 = vld [vmem:[%s892_s26 + $0x18] sm:$0xff]   ;;  %v253_v26 = vunpack.c.l.bf16 %v249_v12  ;;  %v261_v27 = vunpack.c.l.bf16 %v257_v13  ;;  %v285_v28 = vunpack.c.h.bf16 %v249_v12  ;;  %v293_v29 = vunpack.c.h.bf16 %v257_v13  ;;  %v258_v41 = vld [vmem:[%s892_s26 + $0x20] sm:$0xff]   ;;  %v314_v46 = vld [vmem:[%s884_s27 + $0x28] sm:$0xff]   ;;  %s693_s20 = sshra.s32 %s419_s16, 4  ;;  %s699_s30 = scalar_lea.hbm %s966_s2, 128  ;;  %s694_s20 = int_to_ptr.hbm [resolvable:$true] %s693_s20 }
  0x2c   : > { %v264_v14 = vmul.f32 %v260_v4, %v252_v3  ;;  %v296_v15 = vmul.f32 %v292_v6, %v284_v5  ;;  %v272_v16 = vadd.f32 %v260_v4, %v252_v3  ;;  %v304_v17 = vadd.f32 %v292_v6, %v284_v5  ;;  %v322_v47 = vld [vmem:[%s892_s26 + $0x28] sm:$0xff]   ;;  %v251_v0 = vld [vmem:[%s884_s27 + $0x30] sm:$0xff]   ;;  %v315_v6 = vld [vmem:[%s884_s27 + $0x38] sm:$0xff]   ;;  %s695_s19 = scalar_lea.hbm %s694_s20, 64  ;;  %p700_p7 = scmp.lt.s32.totalorder %s694_s20, %s966_s2 }
  0x2d   : > { %v328_v20 = vmul.f32 %v324_v9, %v316_v8  ;;  %v360_v21 = vmul.f32 %v356_v11, %v348_v10  ;;  %v336_v22 = vadd.f32 %v324_v9, %v316_v8  ;;  %v368_v23 = vadd.f32 %v356_v11, %v348_v10  ;;  %v259_v1 = vld [vmem:[%s892_s26 + $0x30] sm:$0xff]   ;;  %v323_v11 = vld [vmem:[%s892_s26 + $0x38] sm:$0xff]   ;;  %p696_p4 = scmp.ne.s32.totalorder %s694_s20, %s695_s19  ;;  %p701_p8 = scmp.lt.s32.totalorder %s699_s30, %s695_s19 }
  0x2e   : > { %v300_v24 = vadd.f32 %v296_v15, %v264_v14  ;;  %v308_v25 = vadd.f32 %v304_v17, %v272_v16  ;;  %v317_v30 = vunpack.c.l.bf16 %v313_v18  ;;  %v325_v31 = vunpack.c.l.bf16 %v321_v19 }
  0x2f   : > { %v265_v34 = vmul.f32 %v261_v27, %v253_v26  ;;  %v349_v35 = vunpack.c.h.bf16 %v313_v18  ;;  %v297_v37 = vmul.f32 %v293_v29, %v285_v28  ;;  %v357_v39 = vunpack.c.h.bf16 %v321_v19  ;;  %p697_p5 = pnand %p696_p4, %p838_p9  ;;  %p702_p10 = por %p701_p8, %p700_p7 }
  0x30   : > { %v332_v32 = vadd.f32 %v328_v20, %v300_v24  ;;  %v340_v33 = vadd.f32 %v336_v22, %v308_v25  ;;  %v329_v38 = vmul.f32 %v325_v31, %v317_v30  ;;  %v273_v40 = vadd.f32 %v261_v27, %v253_v26 }
  0x31   : > { %v305_v44 = vadd.f32 %v293_v29, %v285_v28  ;;  %v337_v45 = vadd.f32 %v325_v31, %v317_v30  ;;  %v301_v48 = vadd.f32 %v297_v37, %v265_v34  ;;  %v361_v49 = vmul.f32 %v357_v39, %v349_v35  ;;  %p698_p6 = pneg %p697_p5 }
  0x32   : > { %v364_v42 = vadd.f32 %v360_v21, %v332_v32  ;;  %v372_v43 = vadd.f32 %v368_v23, %v340_v33  ;;  %v369_v50 = vadd.f32 %v357_v39, %v349_v35  ;;  %v254_v51 = vunpack.c.l.bf16 %v250_v36 }
  0x33   : > { %v309_v52 = vadd.f32 %v305_v44, %v273_v40  ;;  %v262_v53 = vunpack.c.l.bf16 %v258_v41  ;;  %v286_v54 = vunpack.c.h.bf16 %v250_v36  ;;  %v294_v55 = vunpack.c.h.bf16 %v258_v41  ;;  %p703_p13 = pnand %p702_p10, %p698_p6 }
  0x34   : > { %395 = vst [vmem:[%s911_s21] sm:$0xff] %v364_v42  ;;  %v333_v56 = vadd.f32 %v329_v38, %v301_v48  ;;  %v318_v57 = vunpack.c.l.bf16 %v314_v46  ;;  %v326_v58 = vunpack.c.l.bf16 %v322_v47  ;;  %v350_v59 = vunpack.c.h.bf16 %v314_v46 }
  0x35   : > { %396 = vst [vmem:[%s911_s21 + $0x8] sm:$0xff] %v372_v43  ;;  %v341_v60 = vadd.f32 %v337_v45, %v309_v52  ;;  %v266_v61 = vmul.f32 %v262_v53, %v254_v51  ;;  %v298_v62 = vmul.f32 %v294_v55, %v286_v54  ;;  %v358_v63 = vunpack.c.h.bf16 %v322_v47 }
  0x36   : > { %v365_v2 = vadd.f32 %v361_v49, %v333_v56  ;;  %v330_v3 = vmul.f32 %v326_v58, %v318_v57  ;;  %v274_v4 = vadd.f32 %v262_v53, %v254_v51  ;;  %v306_v5 = vadd.f32 %v294_v55, %v286_v54 }
  0x37   : > { %v373_v7 = vadd.f32 %v369_v50, %v341_v60  ;;  %v302_v8 = vadd.f32 %v298_v62, %v266_v61  ;;  %v362_v9 = vmul.f32 %v358_v63, %v350_v59  ;;  %v338_v10 = vadd.f32 %v326_v58, %v318_v57 }
  0x38   : > { %397 = vst [vmem:[%s911_s21 + $0x10] sm:$0xff] %v365_v2  ;;  %v310_v12 = vadd.f32 %v306_v5, %v274_v4  ;;  %v370_v13 = vadd.f32 %v358_v63, %v350_v59  ;;  %v255_v14 = vunpack.c.l.bf16 %v251_v0  ;;  %v263_v15 = vunpack.c.l.bf16 %v259_v1 }
  0x39   : > { %398 = vst [vmem:[%s911_s21 + $0x18] sm:$0xff] %v373_v7  ;;  %v334_v16 = vadd.f32 %v330_v3, %v302_v8  ;;  %v287_v17 = vunpack.c.h.bf16 %v251_v0  ;;  %v295_v18 = vunpack.c.h.bf16 %v259_v1  ;;  %v319_v19 = vunpack.c.l.bf16 %v315_v6 }
  0x3a   : > { %v342_v20 = vadd.f32 %v338_v10, %v310_v12  ;;  %v267_v21 = vmul.f32 %v263_v15, %v255_v14  ;;  %v327_v22 = vunpack.c.l.bf16 %v323_v11  ;;  %v351_v23 = vunpack.c.h.bf16 %v315_v6 }
  0x3b   : > { %v366_v24 = vadd.f32 %v362_v9, %v334_v16  ;;  %v299_v25 = vmul.f32 %v295_v18, %v287_v17  ;;  %v359_v26 = vunpack.c.h.bf16 %v323_v11  ;;  %v275_v27 = vadd.f32 %v263_v15, %v255_v14 }
  0x3c   : > { %v374_v28 = vadd.f32 %v370_v13, %v342_v20  ;;  %v331_v29 = vmul.f32 %v327_v22, %v319_v19  ;;  %v307_v30 = vadd.f32 %v295_v18, %v287_v17  ;;  %v339_v31 = vadd.f32 %v327_v22, %v319_v19 }
  0x3d   : > { %399 = vst [vmem:[%s911_s21 + $0x20] sm:$0xff] %v366_v24  ;;  %v303_v32 = vadd.f32 %v299_v25, %v267_v21  ;;  %v363_v33 = vmul.f32 %v359_v26, %v351_v23  ;;  %v371_v35 = vadd.f32 %v359_v26, %v351_v23 }
  0x3e   : > { %400 = vst [vmem:[%s911_s21 + $0x28] sm:$0xff] %v374_v28  ;;  %v311_v34 = vadd.f32 %v307_v30, %v275_v27 }
  0x3f   : > { %v335_v36 = vadd.f32 %v331_v29, %v303_v32 }
  0x40   : > { %v343_v37 = vadd.f32 %v339_v31, %v311_v34 }
  0x41   : > { %v367_v38 = vadd.f32 %v363_v33, %v335_v36 }
  0x42   : > { %v375_v39 = vadd.f32 %v371_v35, %v343_v37 }
  0x43   : > { %401 = vst [vmem:[%s911_s21 + $0x30] sm:$0xff] %v367_v38 }
  0x44   : > { %402 = vst [vmem:[%s911_s21 + $0x38] sm:$0xff] %v375_v39 }
  0x45   : > { %706 = shalt.err (!%p703_p13)
}
  0x46   : > { %s770_s0 = smov 256   ;;  %s771_s5 = smov 16  }
  0x47   : > { %551 = dma.vmem_to_hbm [thread:$0]  (%p838_p9), %s417_s12, 1024, %s419_s16, %s404_s18, %s770_s0, %s770_s0, %s771_s5  }
  0x48 PF: > { %s433_s27 = sand.u32 1, %s745_s9   ;;  %p561_p0 = pnand %p528_p12, %p845_p11 }
  0x49   : > { %s434_s25 = scalar_lea.sflag [#allocation5], %s433_s27 }
  0x4a   : > { %p562_p1 = pneg %p561_p0 }
  0x4c   : > { %740 = dma.done.wait (%p562_p1), %s434_s25, 1024  }
  0x4d   : > { %742 = vsyncadd (%p562_p1), %s434_s25, 4294966272  ;;  %s21_s14 = sadd.s32 1, %s765_s14   ;;  %s974_s9 = smov %s749_s10 }
  0x4e   : > { %p18_p2 = scmp.ge.s32.totalorder %s21_s14, 4   ;;  %s975_s10 = smov %s753_s11 }
  0x4f   : > { %s976_s11 = smov %s843_s23  ;;  %s977_s12 = smov %s761_s13 }
  0x50   : > { %s978_s13 = smov %s980_s17  ;;  %20 = sbr.rel (!%p18_p2) target bundleno = 10 (0xa), region = 94 }
  0x55   :  { %440 = vsyncpa [#allocation4], 1 }
  0x56   :  { %442 = vsyncpa [#allocation4 + $0x1], 1 }
  0x57   :  { %443 = vsyncpa [#allocation7], 1 }
  0x58   :  { %445 = vsyncpa [#allocation7 + $0x1], 1 }
  0x59   :  { %446 = vsyncpa [#allocation5], 1 }
  0x5a   :  { %448 = vsyncpa [#allocation5 + $0x1], 1 }

</bundles_post_ra>
